<compile_context>
chip_gen: v5e
topology: v5e:2x2
jax: 0.10.0
libtpu: 0.0.40
codegen_flags: <defaults>
</compile_context>

<pallas_src>
import functools

import jax
import jax.numpy as jnp
from jax.experimental import pallas as pl
from jax.experimental.pallas import tpu as pltpu


def _round_up(x: int, m: int) -> int:
    return ((x + m - 1) // m) * m


def _highway_kernel(x_ref, w_ref, b_ref, o_ref):
    """One row-tile of the fused highway encoder.

    x_ref : (TR, Hp)        input rows (hidden padded to a multiple of 128)
    w_ref : (L, Hp, 2*Hp)   per-layer fused [transform | gate] weights, (in, out)
                            stored in the matmul operand dtype (f32 or bf16)
    b_ref : (L, 1, 2*Hp)    per-layer fused [transform | gate] biases (f32)
    o_ref : (TR, Hp)        output rows
    """
    hp = x_ref.shape[-1]
    num_layers = w_ref.shape[0]

    # Carry / gating math in f32; matmul operands in the weight dtype so a
    # bf16 weight tensor hits the fast bf16 MXU path (accumulation is f32).
    x = x_ref[...].astype(jnp.float32)
    for l in range(num_layers):  # small static layer count -> unrolled
        pre = jnp.dot(x.astype(w_ref.dtype), w_ref[l],
                      preferred_element_type=jnp.float32)
        pre = pre + b_ref[l]
        t = jnp.maximum(pre[:, :hp], 0.0)              # ReLU(transform)  (VPU)
        # sigmoid(z) == 0.5*(tanh(z/2)+1): keeps the transcendental on the EUP
        # slot instead of exp + full-precision divide on the VALUs.
        g = 0.5 * (jnp.tanh(0.5 * pre[:, hp:]) + 1.0)
        x = x + g * (t - x)                            # == g*t + (1-g)*x
    o_ref[...] = x.astype(o_ref.dtype)


@functools.partial(jax.jit, static_argnames=("tile_rows", "matmul_dtype"))
def highway_encoder(x, wt, bt, wg, bg, *, tile_rows=None, matmul_dtype=None):
    """Multi-layer highway encoder forward.

    x            : (batch, seq, hidden)
    wt, wg       : (L, hidden, hidden)   weights in (in, out) layout
    bt, bg       : (L, hidden)
    matmul_dtype : optional dtype for the MXU operands only (e.g. "bfloat16").
                   Biases, gating math, and the layer carry stay f32.
                   None -> exact path in the natural promoted dtype.
    """
    B, S, H = x.shape
    L = wt.shape[0]
    rows = B * S
    itemsize = jnp.dtype(x.dtype).itemsize

    # ---- precision handling (explicit, no silent param quantization) --------
    if matmul_dtype is None:
        op_dtype = jnp.result_type(x.dtype, wt.dtype)
    else:
        op_dtype = jnp.dtype(matmul_dtype)
    op_itemsize = jnp.dtype(op_dtype).itemsize

    # ---- static (trace-time) layout decisions -------------------------------
    hp = _round_up(H, 128)                      # lane-dense hidden
    sub = max(8, 8 * (4 // max(1, itemsize)))   # 8 for f32, 16 for bf16

    def vmem_estimate(tr):
        io = tr * hp * itemsize                          # one x / out tile
        # weights & biases are single-buffered (pl.Buffered(1)) -> count ONCE
        w_bytes = L * hp * 2 * hp * op_itemsize + L * 2 * hp * 4
        tmp = tr * 2 * hp * 4 + 3 * tr * hp * 4          # pre + live f32 temps
        return 2 * io + 2 * io + w_bytes + tmp           # double-buffered x & out

    # Generation-aware VMEM budget: ~40 MiB on v7x (64 MiB VMEM),
    # ~80 MiB on v5e/v6e (128 MiB VMEM).
    try:
        vmem_cap = int(pltpu.get_tpu_info().vmem_capacity_bytes)
    except Exception:
        vmem_cap = 64 * 2**20
    vmem_budget = int(0.625 * vmem_cap)

    num_cores = 2  # v7x TensorCores per chip; harmless over-split on v5e/v6e.
    if tile_rows is None:
        tile_rows = min(4096, _round_up(rows, sub))
        # Keep the working set under the generation-specific budget.
        while tile_rows > sub and vmem_estimate(tile_rows) > vmem_budget:
            tile_rows //= 2
        # Guarantee >= 2 grid steps per TensorCore when rows allow it, so the
        # "parallel" axis can shard across cores and the pipeline has depth.
        min_steps = 2 * num_cores
        while (tile_rows > sub
               and _round_up(rows, tile_rows) // tile_rows < min_steps
               and rows > min_steps * sub):
            tile_rows //= 2
        tile_rows = max(sub, _round_up(tile_rows, sub))
    assert tile_rows % sub == 0, "tile_rows must be a multiple of the sublane tile"

    rows_p = _round_up(rows, tile_rows)          # pad rows instead of hard-failing
    grid = (rows_p // tile_rows,)

    # ---- parameter prep: pad hidden to hp, fuse transform|gate --------------
    def pad_w(w):   # (L, H, H) -> (L, hp, hp)
        return jnp.pad(w, ((0, 0), (0, hp - H), (0, hp - H)))

    def pad_b(b):   # (L, H) -> (L, 1, hp)
        return jnp.pad(b, ((0, 0), (0, hp - H))).reshape(L, 1, hp)

    w_cat = jnp.concatenate([pad_w(wt), pad_w(wg)], axis=-1).astype(op_dtype)
    b_cat = jnp.concatenate([pad_b(bt), pad_b(bg)], axis=-1).astype(jnp.float32)
    # Padded hidden columns stay exactly 0 through every layer (zero weights,
    # zero bias, and x + g*(0-0) = 0), so slicing at the end is exact.

    x2d = jnp.pad(x.reshape(rows, H), ((0, rows_p - rows), (0, hp - H)))

    cost = pl.CostEstimate(
        flops=int(4 * L * rows_p * hp * hp),             # (TR,hp)@(hp,2hp) per layer
        transcendentals=int(L * rows_p * hp),            # tanh (sigmoid)
        bytes_accessed=int(2 * rows_p * hp * itemsize
                           + L * hp * 2 * hp * op_itemsize
                           + L * 2 * hp * 4))

    vmem_limit = int(min(int(0.9 * vmem_cap),
                         max(32 * 2**20, 2 * vmem_estimate(tile_rows))))

    # TODO(synk): for very large hidden sizes where L*hp*2hp weights exceed the
    # VMEM budget, stream the weights over the K axis with pltpu.emit_pipeline
    # instead of shrinking tile_rows (v7x 64 MiB VMEM is the first to run out).
    out2d = pl.pallas_call(
        _highway_kernel,
        out_shape=jax.ShapeDtypeStruct((rows_p, hp), x.dtype),
        grid_spec=pltpu.PrefetchScalarGridSpec(
            num_scalar_prefetch=0,
            grid=grid,
            in_specs=[
                pl.BlockSpec((tile_rows, hp), lambda i: (i, 0)),
                # Grid-invariant parameters: single-buffer to halve their
                # resident VMEM (constant index_map -> fetched once).
                pl.BlockSpec((L, hp, 2 * hp), lambda i: (0, 0, 0),
                             pipeline_mode=pl.Buffered(1)),
                pl.BlockSpec((L, 1, 2 * hp), lambda i: (0, 0, 0),
                             pipeline_mode=pl.Buffered(1)),
            ],
            out_specs=pl.BlockSpec((tile_rows, hp), lambda i: (i, 0)),
        ),
        compiler_params=pltpu.CompilerParams(
            dimension_semantics=("parallel",),   # shard row tiles across TCs (v7x)
            vmem_limit_bytes=vmem_limit),
        cost_estimate=cost,
    )(x2d, w_cat, b_cat)

    return out2d[:rows, :H].reshape(B, S, H)


def _reference(x, wt, bt, wg, bg):
    """Plain-JAX reference mirroring the PyTorch forward."""
    L = wt.shape[0]
    for l in range(L):
        t = jax.nn.relu(jnp.einsum("bsh,ho->bso", x, wt[l]) + bt[l])
        g = jax.nn.sigmoid(jnp.einsum("bsh,ho->bso", x, wg[l]) + bg[l])
        x = g * t + (1.0 - g) * x
    return x


if __name__ == "__main__":
    num_layers = 2
    batch, seq, hidden = 2, 8, 32

    key = jax.random.PRNGKey(0)
    kx, kwt, kbt, kwg, kbg = jax.random.split(key, 5)

    x = jax.random.normal(kx, (batch, seq, hidden), dtype=jnp.float32)

    # PyTorch nn.Linear stores (out, in); we store the transpose (in, out)
    # so the kernel computes x @ W + b directly.
    bound = 1.0 / jnp.sqrt(hidden)
    wt = jax.random.uniform(kwt, (num_layers, hidden, hidden),
                            minval=-bound, maxval=bound, dtype=jnp.float32)
    bt = jax.random.uniform(kbt, (num_layers, hidden),
                            minval=-bound, maxval=bound, dtype=jnp.float32)
    wg = jax.random.uniform(kwg, (num_layers, hidden, hidden),
                            minval=-bound, maxval=bound, dtype=jnp.float32)
    bg = jax.random.uniform(kbg, (num_layers, hidden),
                            minval=-bound, maxval=bound, dtype=jnp.float32)

    ref = _reference(x, wt, bt, wg, bg)

    # Exact (f32 MXU) path: tight tolerance against the f32 reference.
    out = highway_encoder(x, wt, bt, wg, bg)
    out = jax.block_until_ready(out)
    assert out.shape == (batch, seq, hidden)
    assert jnp.allclose(out, ref, atol=1e-5, rtol=1e-5), (
        f"f32 path max err {jnp.max(jnp.abs(out - ref))}")

    # Fast bf16-MXU-operand path: relaxed tolerance (operands quantized to bf16,
    # accumulation/gating still f32).
    out_bf16 = highway_encoder(x, wt, bt, wg, bg, matmul_dtype="bfloat16")
    out_bf16 = jax.block_until_ready(out_bf16)
    assert jnp.allclose(out_bf16, ref, atol=5e-2, rtol=5e-2), (
        f"bf16 path max err {jnp.max(jnp.abs(out_bf16 - ref))}")

    print("KERNEL_OK")
</pallas_src>

<mosaic_0001>
module attributes {stable_mosaic.version = 11 : i64} {
  func.func @_highway_kernel(%arg0: i32, %arg1: memref<16x128xf32, #tpu.memory_space<vmem>>, %arg2: memref<2x128x256xf32, #tpu.memory_space<vmem>>, %arg3: memref<2x1x256xf32, #tpu.memory_space<vmem>>, %arg4: memref<16x128xf32, #tpu.memory_space<vmem>>) attributes {dimension_semantics = [#tpu.dimension_semantics<parallel>], iteration_bounds = array<i64: 1>, scalar_prefetch = 0 : i64, scratch_operands = 0 : i64, tpu.core_type = #tpu.core_type<tc>, window_params = [{transform_indices = @transform_0, window_bounds = array<i64: 16, 128>}, {pipeline_mode = #tpu.pipeline_mode<synchronous>, transform_indices = @transform_1, window_bounds = array<i64: 2, 128, 256>}, {pipeline_mode = #tpu.pipeline_mode<synchronous>, transform_indices = @transform_2, window_bounds = array<i64: 2, 1, 256>}, {transform_indices = @transform_3, window_bounds = array<i64: 16, 128>}]} {
    %c0 = arith.constant 0 : index
    %c0_0 = arith.constant 0 : index
    %0 = vector.load %arg1[%c0, %c0_0] : memref<16x128xf32, #tpu.memory_space<vmem>>, vector<16x128xf32>
    %c0_1 = arith.constant 0 : index
    %c0_2 = arith.constant 0 : index
    %c0_3 = arith.constant 0 : index
    %1 = vector.load %arg2[%c0_1, %c0_2, %c0_3] : memref<2x128x256xf32, #tpu.memory_space<vmem>>, vector<1x128x256xf32>
    %2 = vector.shape_cast %1 : vector<1x128x256xf32> to vector<128x256xf32>
    %cst = arith.constant dense<0.000000e+00> : vector<16x256xf32>
    %3 = tpu.matmul %0, %2, %cst {dimension_numbers = #tpu.dot_dimension_numbers<[1], [0], [0], [1], [0, 0, 1, 1], [], []>} : vector<16x128xf32>, vector<128x256xf32>, vector<16x256xf32> -> vector<16x256xf32>
    %c0_4 = arith.constant 0 : index
    %c0_5 = arith.constant 0 : index
    %c0_6 = arith.constant 0 : index
    %4 = vector.load %arg3[%c0_4, %c0_5, %c0_6] : memref<2x1x256xf32, #tpu.memory_space<vmem>>, vector<1x1x256xf32>
    %5 = vector.shape_cast %4 : vector<1x1x256xf32> to vector<1x256xf32>
    %6 = vector.broadcast %5 : vector<1x256xf32> to vector<16x256xf32>
    %7 = arith.addf %3, %6 : vector<16x256xf32>
    %8 = vector.extract_strided_slice %7 {offsets = [0, 0], sizes = [16, 128], strides = [1, 1]} : vector<16x256xf32> to vector<16x128xf32>
    %cst_7 = arith.constant 0.000000e+00 : f32
    %9 = vector.broadcast %cst_7 : f32 to vector<16x128xf32>
    %10 = arith.maximumf %8, %9 : vector<16x128xf32>
    %11 = vector.extract_strided_slice %7 {offsets = [0, 128], sizes = [16, 128], strides = [1, 1]} : vector<16x256xf32> to vector<16x128xf32>
    %cst_8 = arith.constant 5.000000e-01 : f32
    %12 = vector.broadcast %cst_8 : f32 to vector<16x128xf32>
    %13 = arith.mulf %12, %11 : vector<16x128xf32>
    %14 = math.tanh %13 : vector<16x128xf32>
    %cst_9 = arith.constant 1.000000e+00 : f32
    %15 = vector.broadcast %cst_9 : f32 to vector<16x128xf32>
    %16 = arith.addf %14, %15 : vector<16x128xf32>
    %cst_10 = arith.constant 5.000000e-01 : f32
    %17 = vector.broadcast %cst_10 : f32 to vector<16x128xf32>
    %18 = arith.mulf %17, %16 : vector<16x128xf32>
    %19 = arith.subf %10, %0 : vector<16x128xf32>
    %20 = arith.mulf %18, %19 : vector<16x128xf32>
    %21 = arith.addf %0, %20 : vector<16x128xf32>
    %c1 = arith.constant 1 : index
    %c0_11 = arith.constant 0 : index
    %c0_12 = arith.constant 0 : index
    %22 = vector.load %arg2[%c1, %c0_11, %c0_12] : memref<2x128x256xf32, #tpu.memory_space<vmem>>, vector<1x128x256xf32>
    %23 = vector.shape_cast %22 : vector<1x128x256xf32> to vector<128x256xf32>
    %cst_13 = arith.constant dense<0.000000e+00> : vector<16x256xf32>
    %24 = tpu.matmul %21, %23, %cst_13 {dimension_numbers = #tpu.dot_dimension_numbers<[1], [0], [0], [1], [0, 0, 1, 1], [], []>} : vector<16x128xf32>, vector<128x256xf32>, vector<16x256xf32> -> vector<16x256xf32>
    %c1_14 = arith.constant 1 : index
    %c0_15 = arith.constant 0 : index
    %c0_16 = arith.constant 0 : index
    %25 = vector.load %arg3[%c1_14, %c0_15, %c0_16] : memref<2x1x256xf32, #tpu.memory_space<vmem>>, vector<1x1x256xf32>
    %26 = vector.shape_cast %25 : vector<1x1x256xf32> to vector<1x256xf32>
    %27 = vector.broadcast %26 : vector<1x256xf32> to vector<16x256xf32>
    %28 = arith.addf %24, %27 : vector<16x256xf32>
    %29 = vector.extract_strided_slice %28 {offsets = [0, 0], sizes = [16, 128], strides = [1, 1]} : vector<16x256xf32> to vector<16x128xf32>
    %cst_17 = arith.constant 0.000000e+00 : f32
    %30 = vector.broadcast %cst_17 : f32 to vector<16x128xf32>
    %31 = arith.maximumf %29, %30 : vector<16x128xf32>
    %32 = vector.extract_strided_slice %28 {offsets = [0, 128], sizes = [16, 128], strides = [1, 1]} : vector<16x256xf32> to vector<16x128xf32>
    %cst_18 = arith.constant 5.000000e-01 : f32
    %33 = vector.broadcast %cst_18 : f32 to vector<16x128xf32>
    %34 = arith.mulf %33, %32 : vector<16x128xf32>
    %35 = math.tanh %34 : vector<16x128xf32>
    %cst_19 = arith.constant 1.000000e+00 : f32
    %36 = vector.broadcast %cst_19 : f32 to vector<16x128xf32>
    %37 = arith.addf %35, %36 : vector<16x128xf32>
    %cst_20 = arith.constant 5.000000e-01 : f32
    %38 = vector.broadcast %cst_20 : f32 to vector<16x128xf32>
    %39 = arith.mulf %38, %37 : vector<16x128xf32>
    %40 = arith.subf %31, %21 : vector<16x128xf32>
    %41 = arith.mulf %39, %40 : vector<16x128xf32>
    %42 = arith.addf %21, %41 : vector<16x128xf32>
    %c0_21 = arith.constant 0 : index
    %c0_22 = arith.constant 0 : index
    %43 = vector.load %arg4[%c0_21, %c0_22] : memref<16x128xf32, #tpu.memory_space<vmem>>, vector<16x128xf32>
    tpu.vector_store %arg4[%c0_21, %c0_22], %42 {strides = array<i32>} : memref<16x128xf32, #tpu.memory_space<vmem>>, vector<16x128xf32>,
    return
  }
  func.func @transform_0(%arg0: i32) -> (i32, i32) {
    %c0_i32 = arith.constant 0 : i32
    %c0_i32_0 = arith.constant 0 : i32
    return %arg0, %c0_i32 : i32, i32
  }
  func.func @transform_1(%arg0: i32) -> (i32, i32, i32) {
    %c0_i32 = arith.constant 0 : i32
    %c0_i32_0 = arith.constant 0 : i32
    %c0_i32_1 = arith.constant 0 : i32
    %c0_i32_2 = arith.constant 0 : i32
    return %c0_i32, %c0_i32_0, %c0_i32_1 : i32, i32, i32
  }
  func.func @transform_2(%arg0: i32) -> (i32, i32, i32) {
    %c0_i32 = arith.constant 0 : i32
    %c0_i32_0 = arith.constant 0 : i32
    %c0_i32_1 = arith.constant 0 : i32
    %c0_i32_2 = arith.constant 0 : i32
    return %c0_i32, %c0_i32_0, %c0_i32_1 : i32, i32, i32
  }
  func.func @transform_3(%arg0: i32) -> (i32, i32) {
    %c0_i32 = arith.constant 0 : i32
    %c0_i32_0 = arith.constant 0 : i32
    return %arg0, %c0_i32 : i32, i32
  }
}

</mosaic_0001>

<bundles_post_ra>
// kernel: highway_encoder.1
= control target key start
LH: loop header
LB: loop body
LE: loop exit
PB: predicated region body
PF: predicated region fallthrough
CT: control target
= control target key end

     0   :  { %s507_s1 = inlined_call_operand.vmem [shape: f32[2,128,256], index: 1, kind: input, shape index: {}]   ;;  %s508_s0 = inlined_call_operand.vmem [shape: f32[16,128], index: 0, kind: input, shape index: {}]   ;;  %s509_s2 = inlined_call_operand.vmem [shape: f32[2,1,256], index: 2, kind: input, shape index: {}]   ;;  %s510_s3 = inlined_call_operand.vmem [shape: f32[16,128], index: 3, kind: output, shape index: {}]  }
   0x1   :  { %v47_v0 = vld [vmem:[%s507_s1 + $0xf8] sm:$0xff]  ;;  %v45_v1 = vld [vmem:[%s507_s1 + $0xe8] sm:$0xff]  ;;  %v46_v2 = vld [vmem:[%s507_s1 + $0xf0] sm:$0xff] }
   0x2   :  { %77 = vmatpush.msra.mxu1 %v47_v0  ;;  %v43_v3 = vld [vmem:[%s507_s1 + $0xd8] sm:$0xff]  ;;  %54 = vmatpush.msra.mxu0 %v46_v2  ;;  %v44_v4 = vld [vmem:[%s507_s1 + $0xe0] sm:$0xff]  ;;  %v42_v5 = vld [vmem:[%s507_s1 + $0xd0] sm:$0xff] }
   0x3   :  { %v41_v6 = vld [vmem:[%s507_s1 + $0xc8] sm:$0xff]  ;;  %v40_v7 = vld [vmem:[%s507_s1 + $0xc0] sm:$0xff]  ;;  %v39_v8 = vld [vmem:[%s507_s1 + $0xb8] sm:$0xff] }
   0x4   :  { %78 = vmatpush.msra.mxu1 %v45_v1  ;;  %55 = vmatpush.msra.mxu0 %v44_v4  ;;  %v38_v9 = vld [vmem:[%s507_s1 + $0xb0] sm:$0xff]  ;;  %v37_v10 = vld [vmem:[%s507_s1 + $0xa8] sm:$0xff]  ;;  %v36_v11 = vld [vmem:[%s507_s1 + $0xa0] sm:$0xff] }
   0x5   :  { %v35_v12 = vld [vmem:[%s507_s1 + $0x98] sm:$0xff]  ;;  %v34_v13 = vld [vmem:[%s507_s1 + $0x90] sm:$0xff]  ;;  %v33_v16 = vld [vmem:[%s507_s1 + $0x88] sm:$0xff] }
   0x6   :  { %79 = vmatpush.msra.mxu1 %v43_v3  ;;  %56 = vmatpush.msra.mxu0 %v42_v5  ;;  %v254_v14 = vld [vmem:[%s507_s1 + $0x1f0] sm:$0xff]  ;;  %v255_v15 = vld [vmem:[%s507_s1 + $0x1f8] sm:$0xff]  ;;  %v252_v17 = vld [vmem:[%s507_s1 + $0x1e0] sm:$0xff] }
   0x7   :  { %156 = vmatpush.msra.mxu2 %v254_v14  ;;  %v253_v18 = vld [vmem:[%s507_s1 + $0x1e8] sm:$0xff]  ;;  %v32_v19 = vld [vmem:[%s507_s1 + $0x80] sm:$0xff]  ;;  %179 = vmatpush.msra.mxu3 %v255_v15  ;;  %v250_v20 = vld [vmem:[%s507_s1 + $0x1d0] sm:$0xff] }
   0x8   :  { %80 = vmatpush.msra.mxu1 %v41_v6  ;;  %57 = vmatpush.msra.mxu0 %v40_v7  ;;  %v31_v21 = vld [vmem:[%s507_s1 + $0x78] sm:$0xff]  ;;  %v30_v23 = vld [vmem:[%s507_s1 + $0x70] sm:$0xff]  ;;  %v248_v24 = vld [vmem:[%s507_s1 + $0x1c0] sm:$0xff] }
   0x9   :  { %157 = vmatpush.msra.mxu2 %v252_v17  ;;  %v251_v22 = vld [vmem:[%s507_s1 + $0x1d8] sm:$0xff]  ;;  %180 = vmatpush.msra.mxu3 %v253_v18  ;;  %v29_v25 = vld [vmem:[%s507_s1 + $0x68] sm:$0xff]  ;;  %v28_v27 = vld [vmem:[%s507_s1 + $0x60] sm:$0xff] }
   0xa   :  { %81 = vmatpush.msra.mxu1 %v39_v8  ;;  %58 = vmatpush.msra.mxu0 %v38_v9  ;;  %v249_v26 = vld [vmem:[%s507_s1 + $0x1c8] sm:$0xff]  ;;  %v246_v28 = vld [vmem:[%s507_s1 + $0x1b0] sm:$0xff]  ;;  %v27_v29 = vld [vmem:[%s507_s1 + $0x58] sm:$0xff] }
   0xb   :  { %158 = vmatpush.msra.mxu2 %v250_v20  ;;  %181 = vmatpush.msra.mxu3 %v251_v22  ;;  %v247_v30 = vld [vmem:[%s507_s1 + $0x1b8] sm:$0xff]  ;;  %v26_v31 = vld [vmem:[%s507_s1 + $0x50] sm:$0xff]  ;;  %v244_v32 = vld [vmem:[%s507_s1 + $0x1a0] sm:$0xff] }
   0xc   :  { %82 = vmatpush.msra.mxu1 %v37_v10  ;;  %59 = vmatpush.msra.mxu0 %v36_v11  ;;  %v25_v33 = vld [vmem:[%s507_s1 + $0x48] sm:$0xff]  ;;  %v24_v35 = vld [vmem:[%s507_s1 + $0x40] sm:$0xff]  ;;  %v23_v36 = vld [vmem:[%s507_s1 + $0x38] sm:$0xff] }
   0xd   :  { %159 = vmatpush.msra.mxu2 %v248_v24  ;;  %182 = vmatpush.msra.mxu3 %v249_v26  ;;  %v245_v34 = vld [vmem:[%s507_s1 + $0x1a8] sm:$0xff]  ;;  %v22_v37 = vld [vmem:[%s507_s1 + $0x30] sm:$0xff]  ;;  %v20_v39 = vld [vmem:[%s507_s1 + $0x20] sm:$0xff] }
   0xe   :  { %83 = vmatpush.msra.mxu1 %v35_v12  ;;  %60 = vmatpush.msra.mxu0 %v34_v13  ;;  %v21_v38 = vld [vmem:[%s507_s1 + $0x28] sm:$0xff]  ;;  %v19_v40 = vld [vmem:[%s507_s1 + $0x18] sm:$0xff]  ;;  %v18_v41 = vld [vmem:[%s507_s1 + $0x10] sm:$0xff] }
   0xf   :  { %160 = vmatpush.msra.mxu2 %v246_v28  ;;  %183 = vmatpush.msra.mxu3 %v247_v30  ;;  %v17_v42 = vld [vmem:[%s507_s1 + $0x8] sm:$0xff]  ;;  %v417_v43 = vld [vmem:[%s508_s0] sm:$0xff]  ;;  %v242_v46 = vld [vmem:[%s507_s1 + $0x190] sm:$0xff] }
  0x10   :  { %84 = vmatpush.msra.mxu1 %v33_v16  ;;  %61 = vmatpush.msra.mxu0 %v32_v19  ;;  %v16_v44 = vld [vmem:[%s507_s1] sm:$0xff]  ;;  %v427_v45 = vld [vmem:[%s508_s0 + $0x8] sm:$0xff]  ;;  %v243_v47 = vld [vmem:[%s507_s1 + $0x198] sm:$0xff] }
  0x11   :  { %161 = vmatpush.msra.mxu2 %v244_v32  ;;  %184 = vmatpush.msra.mxu3 %v245_v34  ;;  %v240_v48 = vld [vmem:[%s507_s1 + $0x180] sm:$0xff]  ;;  %v241_v49 = vld [vmem:[%s507_s1 + $0x188] sm:$0xff]  ;;  %v238_v50 = vld [vmem:[%s507_s1 + $0x170] sm:$0xff] }
  0x12   :  { %85 = vmatpush.msra.mxu1 %v31_v21  ;;  %62 = vmatpush.msra.mxu0 %v30_v23  ;;  %v239_v51 = vld [vmem:[%s507_s1 + $0x178] sm:$0xff]  ;;  %v236_v52 = vld [vmem:[%s507_s1 + $0x160] sm:$0xff]  ;;  %v237_v53 = vld [vmem:[%s507_s1 + $0x168] sm:$0xff] }
  0x13   :  { %162 = vmatpush.msra.mxu2 %v242_v46  ;;  %185 = vmatpush.msra.mxu3 %v243_v47  ;;  %v234_v54 = vld [vmem:[%s507_s1 + $0x150] sm:$0xff]  ;;  %v235_v55 = vld [vmem:[%s507_s1 + $0x158] sm:$0xff]  ;;  %v232_v56 = vld [vmem:[%s507_s1 + $0x140] sm:$0xff] }
  0x14   :  { %86 = vmatpush.msra.mxu1 %v29_v25  ;;  %63 = vmatpush.msra.mxu0 %v28_v27  ;;  %v233_v57 = vld [vmem:[%s507_s1 + $0x148] sm:$0xff]  ;;  %v230_v58 = vld [vmem:[%s507_s1 + $0x130] sm:$0xff]  ;;  %v231_v59 = vld [vmem:[%s507_s1 + $0x138] sm:$0xff] }
  0x15   :  { %163 = vmatpush.msra.mxu2 %v240_v48  ;;  %186 = vmatpush.msra.mxu3 %v241_v49  ;;  %v228_v60 = vld [vmem:[%s507_s1 + $0x120] sm:$0xff]  ;;  %v229_v61 = vld [vmem:[%s507_s1 + $0x128] sm:$0xff]  ;;  %v226_v62 = vld [vmem:[%s507_s1 + $0x110] sm:$0xff] }
  0x16   :  { %87 = vmatpush.msra.mxu1 %v27_v29  ;;  %64 = vmatpush.msra.mxu0 %v26_v31  ;;  %v227_v63 = vld [vmem:[%s507_s1 + $0x118] sm:$0xff]  ;;  %v224_v0 = vld [vmem:[%s507_s1 + $0x100] sm:$0xff]  ;;  %v225_v1 = vld [vmem:[%s507_s1 + $0x108] sm:$0xff] }
  0x17   :  { %164 = vmatpush.msra.mxu2 %v238_v50  ;;  %187 = vmatpush.msra.mxu3 %v239_v51  ;;  %v48_v2 = vld [vmem:[%s509_s2] sm:$0x3]  ;;  %v256_v29 = vld [vmem:[%s509_s2 + $0x2] sm:$0x3] }
  0x18   :  { %88 = vmatpush.msra.mxu1 %v25_v33  ;;  %65 = vmatpush.msra.mxu0 %v24_v35  ;;  %v51_v3 = vperm.slane %v48_v2, 1  ;;  %v50_v5 = vperm.slane %v48_v2, 0  ;;  %v153_v30 = vperm.slane %v256_v29, 1  ;;  %v152_v34 = vperm.slane %v256_v29, 0 }
  0x19   :  { %165 = vmatpush.msra.mxu2 %v236_v52  ;;  %188 = vmatpush.msra.mxu3 %v237_v53 }
  0x1a   :  { %89 = vmatpush.msra.mxu1 %v23_v36  ;;  %66 = vmatpush.msra.mxu0 %v22_v37 }
  0x1b   :  { %166 = vmatpush.msra.mxu2 %v234_v54  ;;  %189 = vmatpush.msra.mxu3 %v235_v55 }
  0x1c   :  { %90 = vmatpush.msra.mxu1 %v21_v38  ;;  %67 = vmatpush.msra.mxu0 %v20_v39 }
  0x1d   :  { %167 = vmatpush.msra.mxu2 %v232_v56  ;;  %190 = vmatpush.msra.mxu3 %v233_v57 }
  0x1e   :  { %91 = vmatpush.msra.mxu1 %v19_v40  ;;  %68 = vmatpush.msra.mxu0 %v18_v41 }
  0x1f   :  { %168 = vmatpush.msra.mxu2 %v230_v58  ;;  %191 = vmatpush.msra.mxu3 %v231_v59 }
  0x20   :  { %92 = vmatpush.msra.mxu1 %v17_v42  ;;  %69 = vmatpush.msra.mxu0 %v16_v44 }
  0x21   :  { %93 = vmatmul.f32.vlgmr.msra.gmra.mxu1 %v417_v43  ;;  %70 = vmatmul.f32.vlgmr.msra.gmra.mxu0 %v417_v43 }
  0x22   :  { %169 = vmatpush.msra.mxu2 %v228_v60  ;;  %192 = vmatpush.msra.mxu3 %v229_v61 }
  0x24   :  { %170 = vmatpush.msra.mxu2 %v226_v62  ;;  %193 = vmatpush.msra.mxu3 %v227_v63 }
  0x26   :  { %171 = vmatpush.msra.mxu2 %v224_v0  ;;  %194 = vmatpush.msra.mxu3 %v225_v1 }
  0x29   :  { %96 = vmatmul.f32.gmra.mxu1 %v427_v45  ;;  %73 = vmatmul.f32.gmra.mxu0 %v427_v45 }
  0x9e   :  { %v94_v4 = vpop.f32.mrf.mxu1  ;;  %v71_v7 = vpop.f32.mrf.mxu0 }
  0x9f   :  { %v95_v6 = vadd.f32 %v94_v4, %v51_v3  ;;  %v72_v9 = vadd.f32 %v71_v7, %v50_v5 }
  0xa1   :  { %v102_v8 = vmul.f32 0.5, %v95_v6  ;;  %v100_v11 = vmax.f32 %v72_v9, 0.0 }
  0xa3   :  { %257 = vtanh.f32 %v102_v8  ;;  %v110_v17 = vsub.f32 %v100_v11, %v417_v43 }
  0xa6   :  { %v97_v10 = vpop.f32.mrf.mxu1  ;;  %v74_v13 = vpop.f32.mrf.mxu0 }
  0xa7   :  { %v98_v12 = vadd.f32 %v97_v10, %v51_v3  ;;  %v75_v18 = vadd.f32 %v74_v13, %v50_v5 }
  0xa9   :  { %v258_v14 = vpop.eup %257  ;;  %v103_v15 = vmul.f32 0.5, %v98_v12  ;;  %v101_v21 = vmax.f32 %v75_v18, 0.0 }
  0xaa   :  { %v106_v16 = vadd.f32 1.0, %v258_v14 }
  0xab   :  { %259 = vtanh.f32 %v103_v15  ;;  %v111_v25 = vsub.f32 %v101_v21, %v427_v45 }
  0xac   :  { %v108_v19 = vmul.f32 0.5, %v106_v16 }
  0xae   :  { %v112_v20 = vmul.f32 %v110_v17, %v108_v19 }
  0xb0   :  { %v114_v22 = vadd.f32 %v112_v20, %v417_v43 }
  0xb1   :  { %v260_v23 = vpop.eup %259 }
  0xb2   :  { %v107_v24 = vadd.f32 1.0, %v260_v23  ;;  %172 = vmatmul.f32.vlgmr.msra.gmra.mxu2 %v114_v22  ;;  %195 = vmatmul.f32.vlgmr.msra.gmra.mxu3 %v114_v22 }
  0xb4   :  { %v109_v26 = vmul.f32 0.5, %v107_v24 }
  0xb6   :  { %v113_v27 = vmul.f32 %v111_v25, %v109_v26 }
  0xb8   :  { %v115_v28 = vadd.f32 %v113_v27, %v427_v45 }
  0xba   :  { %175 = vmatmul.f32.gmra.mxu2 %v115_v28  ;;  %198 = vmatmul.f32.gmra.mxu3 %v115_v28 }
 0x135   :  { %v196_v31 = vpop.f32.mrf.mxu3  ;;  %v173_v32 = vpop.f32.mrf.mxu2 }
 0x136   :  { %v197_v33 = vadd.f32 %v196_v31, %v153_v30  ;;  %v174_v36 = vadd.f32 %v173_v32, %v152_v34 }
 0x138   :  { %v204_v35 = vmul.f32 0.5, %v197_v33  ;;  %v202_v39 = vmax.f32 %v174_v36, 0.0 }
 0x13a   :  { %261 = vtanh.f32 %v204_v35  ;;  %v212_v44 = vsub.f32 %v202_v39, %v114_v22 }
 0x13d   :  { %v199_v37 = vpop.f32.mrf.mxu3  ;;  %v176_v41 = vpop.f32.mrf.mxu2 }
 0x13e   :  { %v200_v38 = vadd.f32 %v199_v37, %v153_v30  ;;  %v177_v46 = vadd.f32 %v176_v41, %v152_v34 }
 0x140   :  { %v262_v40 = vpop.eup %261  ;;  %v205_v42 = vmul.f32 0.5, %v200_v38  ;;  %v203_v49 = vmax.f32 %v177_v46, 0.0 }
 0x141   :  { %v208_v43 = vadd.f32 1.0, %v262_v40 }
 0x142   :  { %263 = vtanh.f32 %v205_v42  ;;  %v213_v52 = vsub.f32 %v203_v49, %v115_v28 }
 0x143   :  { %v210_v45 = vmul.f32 0.5, %v208_v43 }
 0x145   :  { %v214_v47 = vmul.f32 %v212_v44, %v210_v45 }
 0x147   :  { %v216_v48 = vadd.f32 %v214_v47, %v114_v22 }
 0x148   :  { %v264_v50 = vpop.eup %263 }
 0x149   :  { %218 = vst [vmem:[%s510_s3] sm:$0xff] %v216_v48  ;;  %v209_v51 = vadd.f32 1.0, %v264_v50 }
 0x14b   :  { %v211_v53 = vmul.f32 0.5, %v209_v51 }
 0x14d   :  { %v215_v54 = vmul.f32 %v213_v52, %v211_v53 }
 0x14f   :  { %v217_v55 = vadd.f32 %v215_v54, %v115_v28 }
 0x151   :  { %219 = vst [vmem:[%s510_s3 + $0x8] sm:$0xff] %v217_v55 }

</bundles_post_ra>
